<compile_context>
chip_gen: v7x
topology: tpu7x:2x2x1
jax: 0.10.0
libtpu: 0.0.40
codegen_flags: <defaults>
</compile_context>

<pallas_src>
import functools

import jax
import jax.numpy as jnp
from jax.experimental import pallas as pl
from jax.experimental.pallas import tpu as pltpu


def _round_up(x, m):
    return (x + m - 1) // m * m


def _pick_row_tile(m):
    """Largest multiple-of-8 divisor of m (<= 256) that still leaves >= 2 grid
    steps, so the row axis can be split across TensorCores on v7x."""
    if m <= 8 or m % 8 != 0:
        return m
    best = 8
    for cand in range(8, min(m, 256) + 1, 8):
        if m % cand == 0 and m // cand >= 2:
            best = cand
    return best


def _vmem_limit(block_bytes):
    # double-buffered blocks + slack, clamped well inside v7x's 64 MiB VMEM.
    need = 4 * block_bytes + (2 << 20)
    return int(min(max(need, 16 << 20), 48 << 20))


# ----------------------------------------------------------------------------
# Kernels
# ----------------------------------------------------------------------------
def _conv_partial_stats_kernel(xcol_ref, wmat_ref, conv_ref, part_ref):
    """One row tile: conv as a single bf16 MXU matmul (f32 accumulate) plus
    per-tile partial lane sums / sums-of-squares for the BatchNorm statistics.

    xcol_ref : (tm, Kp)         bf16  im2col'd (KH-folded) input rows
    wmat_ref : (Kp, Wo*Cout)    bf16  KH-folded block-Toeplitz conv weights
    conv_ref : (tm, Wo*Cout)    f32   raw conv output (lane-dense)
    part_ref : (1, 8, Wo*Cout)  f32   sublane 0 = sum over tile rows, 1 = sum of squares
    """
    acc = jnp.dot(xcol_ref[...], wmat_ref[...],
                  preferred_element_type=jnp.float32)
    conv_ref[...] = acc

    lane_sum = jnp.sum(acc, axis=0, keepdims=True)         # (1, Wo*Cout)
    lane_sq = jnp.sum(acc * acc, axis=0, keepdims=True)    # (1, Wo*Cout)
    row = jax.lax.broadcasted_iota(jnp.int32, (8, acc.shape[1]), 0)
    packed = jnp.where(row == 0, lane_sum,
                       jnp.where(row == 1, lane_sq, 0.0))  # (8, Wo*Cout)
    part_ref[...] = packed[None, :, :]


def _bn_apply_relu_kernel(conv_ref, scale_ref, bias_ref, o_ref):
    """out = max(conv * scale + bias, 0); all f32, full-width lane-dense stores."""
    o_ref[...] = jnp.maximum(
        conv_ref[...] * scale_ref[...] + bias_ref[...], 0.0
    ).astype(o_ref.dtype)


# ----------------------------------------------------------------------------
# Hoisted once-per-weight-update prep
# ----------------------------------------------------------------------------
def build_toeplitz_weights(w_oihw, *, padding, w_in):
    """KH-folded block-Toeplitz conv weights, bf16, K padded to a multiple of 128.

    wmat[kh*Wp*Cin + (wo+kw)*Cin + cin, wo*Cout + cout] = w[cout, cin, kh, kw]
    """
    Cout, Cin, KH, KW = w_oihw.shape
    Wp = w_in + 2 * padding
    Wo = Wp - KW + 1
    wk = jnp.transpose(w_oihw, (2, 3, 1, 0)).astype(jnp.float32) \
            .reshape(KH, KW * Cin, Cout)
    cols = [jnp.pad(wk, ((0, 0), (wo * Cin, (Wp - KW - wo) * Cin), (0, 0)))
            for wo in range(Wo)]
    wmat = jnp.concatenate(cols, axis=2).reshape(KH * Wp * Cin, Wo * Cout)
    Kp = _round_up(KH * Wp * Cin, 128)
    wmat = jnp.pad(wmat, ((0, Kp - KH * Wp * Cin), (0, 0)))
    return wmat.astype(jnp.bfloat16)


# ----------------------------------------------------------------------------
# Forward
# ----------------------------------------------------------------------------
@functools.partial(jax.jit, static_argnames=("kernel_hw", "padding", "eps"))
def inception_module_forward(x_nchw, wmat, gamma, beta, *, kernel_hw, padding,
                             eps=1e-5):
    """Conv (no bias) -> BN (batch stats, affine) -> ReLU.  Returns NCHW."""
    N, Cin, H, W = x_nchw.shape
    KH, KW = kernel_hw
    Cout = gamma.shape[0]

    Hp, Wp = H + 2 * padding, W + 2 * padding
    Ho, Wo = Hp - KH + 1, Wp - KW + 1
    WpC, WoC = Wp * Cin, Wo * Cout
    K = KH * WpC
    Kp = wmat.shape[0]
    assert Kp == _round_up(K, 128) and wmat.shape[1] == WoC

    M = N * Ho
    tm = _pick_row_tile(M)
    T = M // tm
    count = N * Ho * Wo

    # ---- layout glue (XLA): NCHW -> NHWC, pad, im2col the KH axis ----
    x = jnp.transpose(x_nchw, (0, 2, 3, 1)).astype(jnp.float32)
    xp = jnp.pad(x, ((0, 0), (padding, padding), (padding, padding), (0, 0)))
    xp3 = xp.reshape(N, Hp, WpC)
    xcol = jnp.concatenate([xp3[:, kh:kh + Ho, :] for kh in range(KH)], axis=-1)
    xcol = xcol.reshape(M, K)
    xcol = jnp.pad(xcol, ((0, 0), (0, Kp - K))).astype(jnp.bfloat16)

    # ---- pass 1: conv (one bf16 dot per row tile) + partial BN stats ----
    blk_bytes_a = tm * Kp * 2 + Kp * WoC * 2 + tm * WoC * 4 + 8 * WoC * 4
    conv_out, partials = pl.pallas_call(
        _conv_partial_stats_kernel,
        out_shape=(jax.ShapeDtypeStruct((M, WoC), jnp.float32),
                   jax.ShapeDtypeStruct((T, 8, WoC), jnp.float32)),
        grid=(T,),
        in_specs=[
            pl.BlockSpec((tm, Kp), lambda i: (i, 0)),
            pl.BlockSpec((Kp, WoC), lambda i: (0, 0)),
        ],
        out_specs=(
            pl.BlockSpec((tm, WoC), lambda i: (i, 0)),
            pl.BlockSpec((1, 8, WoC), lambda i: (i, 0, 0)),
        ),
        compiler_params=pltpu.CompilerParams(
            dimension_semantics=("parallel",),
            vmem_limit_bytes=_vmem_limit(blk_bytes_a),
        ),
        cost_estimate=pl.CostEstimate(
            flops=2 * M * Kp * WoC,
            transcendentals=0,
            bytes_accessed=M * Kp * 2 + Kp * WoC * 2 + M * WoC * 4
                           + T * 8 * WoC * 4,
        ),
    )(xcol, wmat)

    # ---- tiny XLA glue: fold chunked partial sums -> per-channel batch stats ----
    lane_sum = jnp.sum(partials[:, 0, :], axis=0)           # (WoC,)
    lane_sq = jnp.sum(partials[:, 1, :], axis=0)            # (WoC,)
    ch_sum = jnp.sum(lane_sum.reshape(Wo, Cout), axis=0)    # (Cout,)
    ch_sq = jnp.sum(lane_sq.reshape(Wo, Cout), axis=0)      # (Cout,)
    mean = ch_sum / count
    var = ch_sq / count - mean * mean                       # biased var (BN training stats)
    inv_std = jax.lax.rsqrt(var + eps)
    scale = gamma.astype(jnp.float32) * inv_std
    bias = beta.astype(jnp.float32) - mean * scale
    scale_t = jnp.tile(scale, Wo).reshape(1, WoC)           # lane-dense broadcast params
    bias_t = jnp.tile(bias, Wo).reshape(1, WoC)

    # ---- pass 2: fused BN apply + ReLU (f32, parallel row tiles) ----
    blk_bytes_b = 2 * tm * WoC * 4 + 2 * WoC * 4
    out_flat = pl.pallas_call(
        _bn_apply_relu_kernel,
        out_shape=jax.ShapeDtypeStruct((M, WoC), jnp.float32),
        grid=(T,),
        in_specs=[
            pl.BlockSpec((tm, WoC), lambda i: (i, 0)),
            pl.BlockSpec((1, WoC), lambda i: (0, 0)),
            pl.BlockSpec((1, WoC), lambda i: (0, 0)),
        ],
        out_specs=pl.BlockSpec((tm, WoC), lambda i: (i, 0)),
        compiler_params=pltpu.CompilerParams(
            dimension_semantics=("parallel",),
            vmem_limit_bytes=_vmem_limit(blk_bytes_b),
        ),
        cost_estimate=pl.CostEstimate(
            flops=3 * M * WoC,
            transcendentals=0,
            bytes_accessed=2 * M * WoC * 4 + 2 * WoC * 4,
        ),
    )(conv_out, scale_t, bias_t)

    out = out_flat.reshape(N, Ho, Wo, Cout)
    return jnp.transpose(out, (0, 3, 1, 2))


# ----------------------------------------------------------------------------
# Plain-JAX reference for validation
# ----------------------------------------------------------------------------
def _reference_forward(x_nchw, w_oihw, gamma, beta, padding, eps=1e-5):
    y = jax.lax.conv_general_dilated(
        x_nchw, w_oihw, window_strides=(1, 1),
        padding=[(padding, padding), (padding, padding)],
        dimension_numbers=("NCHW", "OIHW", "NCHW"))
    mean = jnp.mean(y, axis=(0, 2, 3), keepdims=True)
    var = jnp.mean((y - mean) ** 2, axis=(0, 2, 3), keepdims=True)
    y = (y - mean) * jax.lax.rsqrt(var + eps)
    y = y * gamma[None, :, None, None] + beta[None, :, None, None]
    return jnp.maximum(y, 0.0)


if __name__ == "__main__":
    # _InceptionModule(inplanes=4, planes=8, kernel_size=3, padding=1, BatchNorm2d)
    N, Cin, H, W = 2, 4, 16, 16
    Cout, KH, KW, padding = 8, 3, 3, 1

    key = jax.random.PRNGKey(0)
    kx, kw = jax.random.split(key)

    x = jax.random.normal(kx, (N, Cin, H, W), dtype=jnp.float32)

    # kaiming_normal_ on Conv2d weight: std = sqrt(2 / fan_in), fan_in = Cin*KH*KW
    fan_in = Cin * KH * KW
    w = jax.random.normal(kw, (Cout, Cin, KH, KW), dtype=jnp.float32) \
        * jnp.sqrt(2.0 / fan_in)

    # BatchNorm2d init per _init_weight: weight=1, bias=0
    gamma = jnp.ones((Cout,), dtype=jnp.float32)
    beta = jnp.zeros((Cout,), dtype=jnp.float32)

    # Hoisted once-per-weight-update prep (bf16 KH-folded block-Toeplitz weights).
    wmat = build_toeplitz_weights(w, padding=padding, w_in=W)

    out = inception_module_forward(x, wmat, gamma, beta,
                                   kernel_hw=(KH, KW), padding=padding)
    out = jax.block_until_ready(out)

    ref = jax.block_until_ready(_reference_forward(x, w, gamma, beta, padding))
    assert out.shape == (N, Cout, H, W), out.shape
    err = float(jnp.max(jnp.abs(out - ref)))
    # bf16 MXU operands vs f32 reference: loosened tolerance.
    assert jnp.allclose(out, ref, atol=5e-2, rtol=5e-2), err

    print("KERNEL_OK")
</pallas_src>

<mosaic_0001>
module attributes {stable_mosaic.version = 11 : i64} {
  func.func @_conv_partial_stats_kernel(%arg0: i32, %arg1: memref<16x256xbf16, #tpu.memory_space<vmem>>, %arg2: memref<256x128xbf16, #tpu.memory_space<vmem>>, %arg3: memref<16x128xf32, #tpu.memory_space<vmem>>, %arg4: memref<1x8x128xf32, #tpu.memory_space<vmem>>) attributes {dimension_semantics = [#tpu.dimension_semantics<parallel>], iteration_bounds = array<i64: 2>, scalar_prefetch = 0 : i64, scratch_operands = 0 : i64, tpu.core_type = #tpu.core_type<tc>, window_params = [{transform_indices = @transform_0, window_bounds = array<i64: 16, 256>}, {pipeline_mode = #tpu.pipeline_mode<synchronous>, transform_indices = @transform_1, window_bounds = array<i64: 256, 128>}, {transform_indices = @transform_2, window_bounds = array<i64: 16, 128>}, {transform_indices = @transform_3, window_bounds = array<i64: 1, 8, 128>}]} {
    %c0 = arith.constant 0 : index
    %c0_0 = arith.constant 0 : index
    %0 = vector.load %arg1[%c0, %c0_0] : memref<16x256xbf16, #tpu.memory_space<vmem>>, vector<16x256xbf16>
    %c0_1 = arith.constant 0 : index
    %c0_2 = arith.constant 0 : index
    %1 = vector.load %arg2[%c0_1, %c0_2] : memref<256x128xbf16, #tpu.memory_space<vmem>>, vector<256x128xbf16>
    %cst = arith.constant dense<0.000000e+00> : vector<16x128xf32>
    %2 = tpu.matmul %0, %1, %cst {dimension_numbers = #tpu.dot_dimension_numbers<[1], [0], [0], [1], [0, 0, 1, 1], [], []>} : vector<16x256xbf16>, vector<256x128xbf16>, vector<16x128xf32> -> vector<16x128xf32>
    %c0_3 = arith.constant 0 : index
    %c0_4 = arith.constant 0 : index
    %3 = vector.load %arg3[%c0_3, %c0_4] : memref<16x128xf32, #tpu.memory_space<vmem>>, vector<16x128xf32>
    tpu.vector_store %arg3[%c0_3, %c0_4], %2 {strides = array<i32>} : memref<16x128xf32, #tpu.memory_space<vmem>>, vector<16x128xf32>,
    %cst_5 = arith.constant dense<0.000000e+00> : vector<128xf32>
    %4 = vector.multi_reduction <add>, %2, %cst_5 [0] : vector<16x128xf32> to vector<128xf32>
    %5 = vector.shape_cast %4 : vector<128xf32> to vector<1x128xf32>
    %6 = arith.mulf %2, %2 : vector<16x128xf32>
    %cst_6 = arith.constant dense<0.000000e+00> : vector<128xf32>
    %7 = vector.multi_reduction <add>, %6, %cst_6 [0] : vector<16x128xf32> to vector<128xf32>
    %8 = vector.shape_cast %7 : vector<128xf32> to vector<1x128xf32>
    %9 = tpu.iota {dimensions = array<i32: 0>} : vector<8x128xi32>
    %c0_i32 = arith.constant 0 : i32
    %10 = vector.broadcast %c0_i32 : i32 to vector<8x128xi32>
    %11 = arith.cmpi eq, %9, %10 : vector<8x128xi32>
    %c1_i32 = arith.constant 1 : i32
    %12 = vector.broadcast %c1_i32 : i32 to vector<8x128xi32>
    %13 = arith.cmpi eq, %9, %12 : vector<8x128xi32>
    %cst_7 = arith.constant 0.000000e+00 : f32
    %14 = vector.shape_cast %8 : vector<1x128xf32> to vector<1x128xf32>
    %15 = vector.broadcast %14 : vector<1x128xf32> to vector<8x128xf32>
    %16 = vector.broadcast %cst_7 : f32 to vector<8x128xf32>
    %17 = arith.select %13, %15, %16 : vector<8x128xi1>, vector<8x128xf32>
    %18 = vector.shape_cast %5 : vector<1x128xf32> to vector<1x128xf32>
    %19 = vector.broadcast %18 : vector<1x128xf32> to vector<8x128xf32>
    %20 = arith.select %11, %19, %17 : vector<8x128xi1>, vector<8x128xf32>
    %21 = vector.shape_cast %20 : vector<8x128xf32> to vector<1x8x128xf32>
    %c0_8 = arith.constant 0 : index
    %c0_9 = arith.constant 0 : index
    %c0_10 = arith.constant 0 : index
    %22 = vector.load %arg4[%c0_8, %c0_9, %c0_10] : memref<1x8x128xf32, #tpu.memory_space<vmem>>, vector<1x8x128xf32>
    tpu.vector_store %arg4[%c0_8, %c0_9, %c0_10], %21 {strides = array<i32>} : memref<1x8x128xf32, #tpu.memory_space<vmem>>, vector<1x8x128xf32>,
    return
  }
  func.func @transform_0(%arg0: i32) -> (i32, i32) {
    %c0_i32 = arith.constant 0 : i32
    %c0_i32_0 = arith.constant 0 : i32
    return %arg0, %c0_i32 : i32, i32
  }
  func.func @transform_1(%arg0: i32) -> (i32, i32) {
    %c0_i32 = arith.constant 0 : i32
    %c0_i32_0 = arith.constant 0 : i32
    %c0_i32_1 = arith.constant 0 : i32
    return %c0_i32, %c0_i32_0 : i32, i32
  }
  func.func @transform_2(%arg0: i32) -> (i32, i32) {
    %c0_i32 = arith.constant 0 : i32
    %c0_i32_0 = arith.constant 0 : i32
    return %arg0, %c0_i32 : i32, i32
  }
  func.func @transform_3(%arg0: i32) -> (i32, i32, i32) {
    %c0_i32 = arith.constant 0 : i32
    %c0_i32_0 = arith.constant 0 : i32
    %c0_i32_1 = arith.constant 0 : i32
    return %arg0, %c0_i32, %c0_i32_0 : i32, i32, i32
  }
}

module attributes {stable_mosaic.version = 11 : i64} {
  func.func @_bn_apply_relu_kernel(%arg0: i32, %arg1: memref<16x128xf32, #tpu.memory_space<vmem>>, %arg2: memref<1x128xf32, #tpu.memory_space<vmem>>, %arg3: memref<1x128xf32, #tpu.memory_space<vmem>>, %arg4: memref<16x128xf32, #tpu.memory_space<vmem>>) attributes {dimension_semantics = [#tpu.dimension_semantics<parallel>], iteration_bounds = array<i64: 2>, scalar_prefetch = 0 : i64, scratch_operands = 0 : i64, tpu.core_type = #tpu.core_type<tc>, window_params = [{transform_indices = @transform_0, window_bounds = array<i64: 16, 128>}, {pipeline_mode = #tpu.pipeline_mode<synchronous>, transform_indices = @transform_1, window_bounds = array<i64: 1, 128>}, {pipeline_mode = #tpu.pipeline_mode<synchronous>, transform_indices = @transform_2, window_bounds = array<i64: 1, 128>}, {transform_indices = @transform_3, window_bounds = array<i64: 16, 128>}]} {
    %c0 = arith.constant 0 : index
    %c0_0 = arith.constant 0 : index
    %0 = vector.load %arg1[%c0, %c0_0] : memref<16x128xf32, #tpu.memory_space<vmem>>, vector<16x128xf32>
    %c0_1 = arith.constant 0 : index
    %c0_2 = arith.constant 0 : index
    %1 = vector.load %arg2[%c0_1, %c0_2] : memref<1x128xf32, #tpu.memory_space<vmem>>, vector<1x128xf32>
    %2 = vector.broadcast %1 : vector<1x128xf32> to vector<16x128xf32>
    %3 = arith.mulf %0, %2 : vector<16x128xf32>
    %c0_3 = arith.constant 0 : index
    %c0_4 = arith.constant 0 : index
    %4 = vector.load %arg3[%c0_3, %c0_4] : memref<1x128xf32, #tpu.memory_space<vmem>>, vector<1x128xf32>
    %5 = vector.broadcast %4 : vector<1x128xf32> to vector<16x128xf32>
    %6 = arith.addf %3, %5 : vector<16x128xf32>
    %cst = arith.constant 0.000000e+00 : f32
    %7 = vector.broadcast %cst : f32 to vector<16x128xf32>
    %8 = arith.maximumf %6, %7 : vector<16x128xf32>
    %c0_5 = arith.constant 0 : index
    %c0_6 = arith.constant 0 : index
    %9 = vector.load %arg4[%c0_5, %c0_6] : memref<16x128xf32, #tpu.memory_space<vmem>>, vector<16x128xf32>
    tpu.vector_store %arg4[%c0_5, %c0_6], %8 {strides = array<i32>} : memref<16x128xf32, #tpu.memory_space<vmem>>, vector<16x128xf32>,
    return
  }
  func.func @transform_0(%arg0: i32) -> (i32, i32) {
    %c0_i32 = arith.constant 0 : i32
    %c0_i32_0 = arith.constant 0 : i32
    return %arg0, %c0_i32 : i32, i32
  }
  func.func @transform_1(%arg0: i32) -> (i32, i32) {
    %c0_i32 = arith.constant 0 : i32
    %c0_i32_0 = arith.constant 0 : i32
    %c0_i32_1 = arith.constant 0 : i32
    return %c0_i32, %c0_i32_0 : i32, i32
  }
  func.func @transform_2(%arg0: i32) -> (i32, i32) {
    %c0_i32 = arith.constant 0 : i32
    %c0_i32_0 = arith.constant 0 : i32
    %c0_i32_1 = arith.constant 0 : i32
    return %c0_i32, %c0_i32_0 : i32, i32
  }
  func.func @transform_3(%arg0: i32) -> (i32, i32) {
    %c0_i32 = arith.constant 0 : i32
    %c0_i32_0 = arith.constant 0 : i32
    return %arg0, %c0_i32 : i32, i32
  }
}

</mosaic_0001>

<bundles_post_ra>
// kernel: tile.18
= control target key start
LH: loop header
LB: loop body
LE: loop exit
PB: predicated region body
PF: predicated region fallthrough
CT: control target
= control target key end

     0   :  { %s28_s0 = inlined_call_operand.vmem [shape: f32[8], index: 0, kind: input, shape index: {}]   ;;  %s29_s1 = inlined_call_operand.vmem [shape: f32[16,8], index: 1, kind: output, shape index: {}]  }
   0x1   :  { %v4_v0 = vld [vmem:[%s28_s0] ss:$0 sm:$0xff] }
   0x2   :  { %5 = vst [vmem:[%s29_s1] sm:$0xff] %v4_v0  ;;  %8 = vst [vmem:[%s29_s1 + $0x8] sm:$0xff] %v4_v0 }

// kernel: tile.19
= control target key start
LH: loop header
LB: loop body
LE: loop exit
PB: predicated region body
PF: predicated region fallthrough
CT: control target
= control target key end

     0   :  { %s131_s10 = smov 120   ;;  %s132_s11 = smov 104   ;;  %vm3_vm0 = vcmask 64512   ;;  %vm9_vm1 = vcmask 1048512   ;;  %vm15_vm2 = vcmask 982912   ;;  %vm21_vm3 = vcmask 917312   ;;  %s207_s0 = inlined_call_operand.vmem [shape: f32[16,8], index: 0, kind: input, shape index: {}]   ;;  %s208_s1 = inlined_call_operand.vmem [shape: f32[1,128], index: 1, kind: output, shape index: {}]  }
   0x1   :  { %v101_v0 = vld [vmem:[%s207_s0 + $0xf] sm:$0x1]   ;;  %v103_v1 = vld [vmem:[%s207_s0 + $0xd] sm:$0x1]   ;;  %v102_v2 = vld [vmem:[%s207_s0 + $0xe] sm:$0x1]  }
   0x2   :  { %7 = vrot.lane.b32.xlu0 %v101_v0, %s131_s10  ;;  %19 = vrot.lane.b32.xlu1 %v103_v1, %s132_s11  ;;  %v104_v3 = vld [vmem:[%s207_s0 + $0xc] sm:$0x1]   ;;  %s133_s16 = smov 112   ;;  %s134_s17 = smov 96   ;;  %v105_v4 = vld [vmem:[%s207_s0 + $0xb] sm:$0x1]  }
   0x3   :  { %v106_v5 = vld [vmem:[%s207_s0 + $0xa] sm:$0x1]   ;;  %v2_v6 = vld [vmem:[%s207_s0] sm:$0x1]   ;;  %s135_s24 = smov 88   ;;  %s136_s25 = smov 80  }
   0x4   :  { %4 = vst.msk [vmem:[#allocation0] sm:$0x1] %vm3_vm0, %v2_v6   ;;  %v107_v7 = vld [vmem:[%s207_s0 + $0x9] sm:$0x1]   ;;  %v108_v8 = vld [vmem:[%s207_s0 + $0x8] sm:$0x1]  }
   0x5   :  { %s137_s30 = smov 72   ;;  %s138_s2 = smov 64   ;;  %v109_v9 = vld [vmem:[%s207_s0 + $0x7] sm:$0x1]   ;;  %v110_v10 = vld [vmem:[%s207_s0 + $0x6] sm:$0x1]  }
   0x6   :  { %13 = vrot.lane.b32.xlu0 %v102_v2, %s133_s16  ;;  %25 = vrot.lane.b32.xlu1 %v104_v3, %s134_s17  ;;  %s139_s7 = smov 56   ;;  %s140_s8 = smov 48   ;;  %v111_v11 = vld [vmem:[%s207_s0 + $0x5] sm:$0x1]   ;;  %v112_v12 = vld [vmem:[%s207_s0 + $0x4] sm:$0x1]  }
   0x7   :  { %s141_s13 = smov 40   ;;  %s142_s14 = smov 32   ;;  %v113_v13 = vld [vmem:[%s207_s0 + $0x3] sm:$0x1]   ;;  %v114_v14 = vld [vmem:[%s207_s0 + $0x2] sm:$0x1]  }
   0x8   :  { %s143_s19 = smov 24   ;;  %s144_s20 = smov 16   ;;  %v115_v15 = vld [vmem:[%s207_s0 + $0x1] sm:$0x1]   ;;  %vm27_vm4 = vcmask 851712   ;;  %vm33_vm5 = vcmask 786112  }
   0x9   :  { %s145_s0 = smov 8   ;;  %vm39_vm6 = vcmask 720512   ;;  %vm45_vm7 = vcmask 654912   ;;  %vm51_vm8 = vcmask 589312   ;;  %vm57_vm9 = vcmask 523712  }
   0xa   :  { %31 = vrot.lane.b32.xlu0 %v105_v4, %s135_s24  ;;  %37 = vrot.lane.b32.xlu1 %v106_v5, %s136_s25  ;;  %vm63_vm10 = vcmask 458112   ;;  %vm69_vm11 = vcmask 392512   ;;  %vm75_vm12 = vcmask 326912   ;;  %vm81_vm13 = vcmask 261312  }
   0xb   :  { %vm87_vm14 = vcmask 195712   ;;  %vm93_vm15 = vcmask 130112  }
   0xe   :  { %43 = vrot.lane.b32.xlu0 %v107_v7, %s137_s30  ;;  %49 = vrot.lane.b32.xlu1 %v108_v8, %s138_s2 }
  0x12   :  { %55 = vrot.lane.b32.xlu0 %v109_v9, %s139_s7  ;;  %61 = vrot.lane.b32.xlu1 %v110_v10, %s140_s8 }
  0x16   :  { %67 = vrot.lane.b32.xlu0 %v111_v11, %s141_s13  ;;  %73 = vrot.lane.b32.xlu1 %v112_v12, %s142_s14 }
  0x1a   :  { %79 = vrot.lane.b32.xlu0 %v113_v13, %s143_s19  ;;  %85 = vrot.lane.b32.xlu1 %v114_v14, %s144_s20 }
  0x1e   :  { %91 = vrot.lane.b32.xlu0 %v115_v15, %s145_s0 }
  0x74   :  { %v8_v16 = vpop.permute.xlu0 %7   ;;  %v20_v17 = vpop.permute.xlu1 %19  }
  0x75   :  { %10 = vst.msk [vmem:[#allocation0] sm:$0x1] %vm9_vm1, %v8_v16  }
  0x78   :  { %v14_v18 = vpop.permute.xlu0 %13   ;;  %v26_v19 = vpop.permute.xlu1 %25  }
  0x79   :  { %16 = vst.msk [vmem:[#allocation0] sm:$0x1] %vm15_vm2, %v14_v18  }
  0x7a   :  { %22 = vst.msk [vmem:[#allocation0] sm:$0x1] %vm21_vm3, %v20_v17  }
  0x7b   :  { %28 = vst.msk [vmem:[#allocation0] sm:$0x1] %vm27_vm4, %v26_v19  }
  0x7c   :  { %v32_v20 = vpop.permute.xlu0 %31   ;;  %v38_v21 = vpop.permute.xlu1 %37  }
  0x7d   :  { %34 = vst.msk [vmem:[#allocation0] sm:$0x1] %vm33_vm5, %v32_v20  }
  0x7e   :  { %40 = vst.msk [vmem:[#allocation0] sm:$0x1] %vm39_vm6, %v38_v21  }
  0x80   :  { %v44_v22 = vpop.permute.xlu0 %43   ;;  %v50_v23 = vpop.permute.xlu1 %49  }
  0x81   :  { %46 = vst.msk [vmem:[#allocation0] sm:$0x1] %vm45_vm7, %v44_v22  }
  0x82   :  { %52 = vst.msk [vmem:[#allocation0] sm:$0x1] %vm51_vm8, %v50_v23  }
  0x84   :  { %v56_v24 = vpop.permute.xlu0 %55   ;;  %v62_v25 = vpop.permute.xlu1 %61  }
  0x85   :  { %58 = vst.msk [vmem:[#allocation0] sm:$0x1] %vm57_vm9, %v56_v24  }
  0x86   :  { %64 = vst.msk [vmem:[#allocation0] sm:$0x1] %vm63_vm10, %v62_v25  }
  0x88   :  { %v68_v26 = vpop.permute.xlu0 %67   ;;  %v74_v27 = vpop.permute.xlu1 %73  }
  0x89   :  { %70 = vst.msk [vmem:[#allocation0] sm:$0x1] %vm69_vm11, %v68_v26  }
  0x8a   :  { %76 = vst.msk [vmem:[#allocation0] sm:$0x1] %vm75_vm12, %v74_v27  }
  0x8c   :  { %v80_v28 = vpop.permute.xlu0 %79   ;;  %v86_v29 = vpop.permute.xlu1 %85  }
  0x8d   :  { %82 = vst.msk [vmem:[#allocation0] sm:$0x1] %vm81_vm13, %v80_v28  }
  0x8e   :  { %88 = vst.msk [vmem:[#allocation0] sm:$0x1] %vm87_vm14, %v86_v29  }
  0x90   :  { %v92_v30 = vpop.permute.xlu0 %91  }
  0x91   :  { %94 = vst.msk [vmem:[#allocation0] sm:$0x1] %vm93_vm15, %v92_v30  }
  0x98   :  { %v98_v31 = vld [vmem:[#allocation0] sm:$0x1] }
  0x99   :  { %100 = vst [vmem:[%s208_s1] sm:$0x1] %v98_v31 }

// kernel: inception_module_forward.3
= control target key start
LH: loop header
LB: loop body
LE: loop exit
PB: predicated region body
PF: predicated region fallthrough
CT: control target
= control target key end

     0   :  { %s303_s12 = smov 0   ;;  %s320_s0 = inlined_call_operand.vmem [shape: f32[32,128], index: 0, kind: input, shape index: {}]   ;;  %s321_s1 = inlined_call_operand.vmem [shape: f32[1,128], index: 1, kind: input, shape index: {}]   ;;  %s322_s2 = inlined_call_operand.vmem [shape: f32[1,128], index: 2, kind: input, shape index: {}]   ;;  %s323_s3 = inlined_call_operand.vmem [shape: f32[32,128], index: 3, kind: output, shape index: {}]  }
   0x1 LB: > { %s254_s13 = sadd.s32 4294967295, %s281_s12   ;;  %p258_p0 = scmp.ge.s32.totalorder %s281_s12, 1  ;;  %s281_s12 = sphi %s303_s12, %s13_s12  }
   0x2   : > { %p138_p1 = scmp.lt.s32.totalorder %s281_s12, 3 }
   0x4   : > { %p139_p2 = pnand %p258_p0, %p138_p1 }
   0x5   : > { %s259_s14 = sshll.u32 (!%p139_p2), %s254_s13, 1  ;;  %v263_v0 = vld [vmem:[%s321_s1] ss:$0 sm:$0xff] (!%p139_p2) }
   0x6   : > { %142 = sbr.rel (%p139_p2) target bundleno = 24 (0x18), region = 32  ;;  %p163_p3 = scmp.lt.s32.totalorder (!%p139_p2), %s259_s14, 3  ;;  %v264_v3 = vld [vmem:[%s322_s2] ss:$0 sm:$0xff] (!%p139_p2) }
   0xd   : > { %s325_s14 = smov (!%p163_p3, %s259_s14), 3 }
   0xe   : > { %s260_s15 = sshll.u32 %s325_s14, 3 }
   0xf   : > { %s166_s20 = scalar_lea.vmem %s320_s0, %s260_s15  ;;  %s172_s25 = scalar_lea.vmem %s323_s3, %s260_s15 }
  0x10   : > { %v174_v1 = vld [vmem:[%s166_s20] sm:$0xff]  ;;  %v175_v2 = vld [vmem:[%s166_s20 + $0x8] sm:$0xff] }
  0x11   : > { %v183_v4 = vmul.f32 %v263_v0, %v174_v1  ;;  %v184_v5 = vmul.f32 %v263_v0, %v175_v2 }
  0x13   : > { %v192_v6 = vadd.f32 %v264_v3, %v183_v4  ;;  %v193_v7 = vadd.f32 %v264_v3, %v184_v5 }
  0x15   : > { %v194_v8 = vmax.f32 %v192_v6, 0.0  ;;  %v195_v9 = vmax.f32 %v193_v7, 0.0 }
  0x17   : > { %196 = vst [vmem:[%s172_s25] sm:$0xff] %v194_v8  ;;  %197 = vst [vmem:[%s172_s25 + $0x8] sm:$0xff] %v195_v9 }
  0x18 PF: > { %s13_s12 = sadd.s32 1, %s281_s12  }
  0x19   : > { %p10_p4 = scmp.ge.s32.totalorder %s13_s12, 4  }
  0x1b   :  { %12 = sbr.rel (!%p10_p4) target bundleno = 1 (0x1), region = 62 }

// kernel: inception_module_forward.2
= control target key start
LH: loop header
LB: loop body
LE: loop exit
PB: predicated region body
PF: predicated region fallthrough
CT: control target
= control target key end

     0   :  { %s591_s12 = smov 0   ;;  %s667_s0 = inlined_call_operand.vmem [shape: bf16[32,256], index: 0, kind: input, shape index: {}]   ;;  %s668_s1 = inlined_call_operand.vmem [shape: bf16[256,128], index: 1, kind: input, shape index: {}]   ;;  %s669_s2 = inlined_call_operand.vmem [shape: f32[32,128], index: 2, kind: output, shape index: {0}]   ;;  %s670_s3 = inlined_call_operand.vmem [shape: f32[2,8,128], index: 3, kind: output, shape index: {1}]  }
   0x1 LB: > { %s597_s13 = sadd.s32 4294967295, %s569_s12   ;;  %p486_p0 = scmp.ge.s32.totalorder %s569_s12, 1  ;;  %s569_s12 = sphi %s591_s12, %s14_s12  }
   0x2   : > { %p142_p1 = scmp.lt.s32.totalorder %s569_s12, 3 }
   0x4   : > { %p143_p2 = pnand %p486_p0, %p142_p1 }
   0x5   : > { %v544_v0 = vld [vmem:[%s668_s1 + $0x40] sm:$0xff] (!%p143_p2)   ;;  %s487_s16 = sshll.u32 (!%p143_p2), %s597_s13, 1  ;;  %v546_v2 = vld [vmem:[%s668_s1 + $0x48] sm:$0xff] (!%p143_p2)   ;;  %v548_v4 = vld [vmem:[%s668_s1 + $0x50] sm:$0xff] (!%p143_p2)   ;;  %p184_p4 = scmp.lt.s32.totalorder (!%p143_p2), %s597_s13, 1  ;;  %v388_v31 = vlaneseq (!%p143_p2) }
   0x6   : > { %146 = sbr.rel (%p143_p2) target bundleno = 274 (0x112), region = 28  ;;  %v545_v1 = vld [vmem:[%s668_s1] sm:$0xff] (!%p143_p2)   ;;  %514 = vmatprep.subr.bf16.mxu0 (!%p143_p2), %v544_v0  ;;  %v547_v3 = vld [vmem:[%s668_s1 + $0x8] sm:$0xff] (!%p143_p2)   ;;  %p172_p3 = scmp.lt.s32.totalorder (!%p143_p2), %s487_s16, 3  ;;  %v549_v5 = vld [vmem:[%s668_s1 + $0x10] sm:$0xff] (!%p143_p2)  }
   0x7   : > { %515 = vmatpush3.bf16.msra.mxu0 (!%p143_p2), %v545_v1  ;;  %v550_v6 = vld [vmem:[%s668_s1 + $0x58] sm:$0xff] (!%p143_p2)   ;;  %v552_v8 = vld [vmem:[%s668_s1 + $0x60] sm:$0xff] (!%p143_p2)   ;;  %v554_v10 = vld [vmem:[%s668_s1 + $0x68] sm:$0xff] (!%p143_p2)   ;;  %v389_v36 = vshrl.u32 (!%p143_p2), %v388_v31, 7 }
   0x8   : > { %516 = vmatprep.subr.bf16.mxu0 (!%p143_p2), %v546_v2  ;;  %v551_v7 = vld [vmem:[%s668_s1 + $0x18] sm:$0xff] (!%p143_p2)   ;;  %v553_v9 = vld [vmem:[%s668_s1 + $0x20] sm:$0xff] (!%p143_p2)   ;;  %v555_v12 = vld [vmem:[%s668_s1 + $0x28] sm:$0xff] (!%p143_p2)  }
   0x9   : > { %v556_v13 = vld [vmem:[%s668_s1 + $0x70] sm:$0xff] (!%p143_p2)   ;;  %v558_v15 = vld [vmem:[%s668_s1 + $0x78] sm:$0xff] (!%p143_p2)   ;;  %vm391_vm0 = vcmp.eq.s32.totalorder (!%p143_p2), %v389_v36, 1  ;;  %vm390_vm1 = vcmp.eq.s32.totalorder (!%p143_p2), %v389_v36, 0 }
   0xa   : > { %v557_v14 = vld [vmem:[%s668_s1 + $0x30] sm:$0xff] (!%p143_p2)   ;;  %v559_v16 = vld [vmem:[%s668_s1 + $0x38] sm:$0xff] (!%p143_p2)  }
   0xb   : > { %517 = vmatpush3.bf16.msra.mxu0 (!%p143_p2), %v547_v3 }
   0xc   : > { %518 = vmatprep.subr.bf16.mxu0 (!%p143_p2), %v548_v4 }
   0xd   : > { %s672_s16 = smov (!%p172_p3, %s487_s16), 3  ;;  %s674_s13 = smov (!%p184_p4, %s597_s13), 1 }
   0xe   : > { %s513_s4 = sshll.u32 %s672_s16, 3  ;;  %s492_s29 = sshll.u32 %s674_s13, 3 }
   0xf   : > { %519 = vmatpush3.bf16.msra.mxu0 %v549_v5  ;;  %s176_s9 = scalar_lea.vmem %s667_s0, %s513_s4  ;;  %s182_s28 = scalar_lea.vmem %s669_s2, %s513_s4 }
  0x10   : > { %520 = vmatprep.subr.bf16.mxu0 %v550_v6  ;;  %v562_v11 = vld [vmem:[%s176_s9 + $0x4] ss:$8 sps:$4 sm:$0xff]   ;;  %v560_v17 = vld [vmem:[%s176_s9] ss:$8 sps:$4 sm:$0xff]   ;;  %s187_s5 = scalar_lea.vmem %s670_s3, %s492_s29 }
  0x11   : > { %361 = vmatprep.mubr.bf16.mxu0 %v562_v11 }
  0x13   : > { %521 = vmatpush3.bf16.msra.mxu0 %v551_v7 }
  0x14   : > { %522 = vmatprep.subr.bf16.mxu0 %v552_v8 }
  0x17   : > { %523 = vmatpush3.bf16.msra.mxu0 %v553_v9 }
  0x18   : > { %524 = vmatprep.subr.bf16.mxu0 %v554_v10 }
  0x1b   : > { %525 = vmatpush3.bf16.msra.mxu0 %v555_v12 }
  0x1c   : > { %526 = vmatprep.subr.bf16.mxu0 %v556_v13 }
  0x1f   : > { %527 = vmatpush3.bf16.msra.mxu0 %v557_v14 }
  0x20   : > { %528 = vmatprep.subr.bf16.mxu0 %v558_v15 }
  0x23   : > { %529 = vmatpush3.bf16.msra.mxu0 %v559_v16 }
  0x26   : > { %362 = vmatmul.mubr.bf16.vlgmr.msra.gmra.mrb[0].mxu0 %v560_v17 }
  0xf9   : > { %v530_v18 = vpop.f32.mrb[0].mxu0 }
  0xfa   : > { %v531_v19 = vpop.f32.mrb[1].mxu0 }
  0xfb   : > { %v532_v20 = vadd.f32 %v531_v19, %v530_v18  ;;  %v533_v21 = vpop.f32.mrb[2].mxu0 }
  0xfc   : > { %v534_v22 = vpop.f32.mrb[3].mxu0 }
  0xfd   : > { %370 = vst [vmem:[%s182_s28] sm:$0xff] %v532_v20  ;;  %v535_v23 = vadd.f32 %v534_v22, %v533_v21  ;;  %v379_v24 = vmul.f32 %v532_v20, %v532_v20 }
  0xff   : > { %371 = vst [vmem:[%s182_s28 + $0x8] sm:$0xff] %v535_v23  ;;  %v372_v25 = vadd.f32 %v535_v23, %v532_v20  ;;  %v380_v26 = vmul.f32 %v535_v23, %v535_v23 }
 0x101   : > { %v373_v27 = vrot.slane %v372_v25, 4  ;;  %v381_v28 = vadd.f32 %v380_v26, %v379_v24 }
 0x103   : > { %v374_v29 = vadd.f32 %v373_v27, %v372_v25  ;;  %v382_v30 = vrot.slane %v381_v28, 4 }
 0x105   : > { %v375_v32 = vrot.slane %v374_v29, 2  ;;  %v383_v33 = vadd.f32 %v382_v30, %v381_v28 }
 0x107   : > { %v376_v34 = vadd.f32 %v375_v32, %v374_v29  ;;  %v384_v35 = vrot.slane %v383_v33, 2 }
 0x109   : > { %v385_v37 = vadd.f32 %v384_v35, %v383_v33  ;;  %v377_v38 = vrot.slane %v376_v34, 1 }
 0x10b   : > { %v386_v39 = vrot.slane %v385_v37, 1  ;;  %v378_v41 = vadd.f32 %v377_v38, %v376_v34 }
 0x10d   : > { %v387_v40 = vadd.f32 %v386_v39, %v385_v37 }
 0x10f   : > { %v392_v42 = vsel %vm391_vm0, %v387_v40, 0.0 }
 0x110   : > { %v393_v43 = vsel %vm390_vm1, %v378_v41, %v392_v42 }
 0x111   : > { %394 = vst [vmem:[%s187_s5] sm:$0xff] %v393_v43 }
 0x112 PF: > { %s14_s12 = sadd.s32 1, %s569_s12  }
 0x113   : > { %p11_p5 = scmp.ge.s32.totalorder %s14_s12, 4  }
 0x115   :  { %13 = sbr.rel (!%p11_p5) target bundleno = 1 (0x1), region = 70 }

</bundles_post_ra>
